<compile_context>
chip_gen: v7x
topology: tpu7x:2x2x1
jax: 0.10.0
libtpu: 0.0.40
codegen_flags: <defaults>
</compile_context>

<pallas_src>
import math

import jax
import jax.numpy as jnp
from jax.experimental import pallas as pl
from jax.experimental.pallas import tpu as pltpu

# Padded feature widths and the index of the "ones" lane at each stage.
D_IN, D_H1, D_H2, D_H3 = 16, 128, 512, 128
ONE_IN, ONE_H1, ONE_H2, ONE_H3 = 15, 127, 511, 127


def mlp_kernel(x_ref, w1_ref, w2_ref, w3_ref, w4_ref, o_ref):
    x = x_ref[...]                                                  # (TB, 16) bf16

    h = jnp.dot(x, w1_ref[...], preferred_element_type=jnp.float32)
    h = jnp.maximum(h, 0.0).astype(jnp.bfloat16)                    # (TB, 128)

    h = jnp.dot(h, w2_ref[...], preferred_element_type=jnp.float32)
    h = jnp.maximum(h, 0.0).astype(jnp.bfloat16)                    # (TB, 512)

    h = jnp.dot(h, w3_ref[...], preferred_element_type=jnp.float32)
    h = jnp.maximum(h, 0.0)                                         # (TB, 128) f32

    # Final Linear(100,1)+bias (bias fused into lane 127 of w4) as a VPU
    # multiply + lane reduction; avoids an N=1 MXU matmul and frees the MXU.
    w4 = w4_ref[...].astype(jnp.float32)                            # (1, 128)
    z = jnp.sum(h * w4, axis=-1, keepdims=True)                     # (TB, 1)
    o_ref[...] = jax.nn.sigmoid(z)


def init_linear(key, fan_in, fan_out):
    # Matches torch.nn.Linear default init: U(-1/sqrt(fan_in), +1/sqrt(fan_in))
    kw, kb = jax.random.split(key)
    bound = 1.0 / math.sqrt(fan_in)
    w = jax.random.uniform(kw, (fan_in, fan_out), jnp.float32, -bound, bound)
    b = jax.random.uniform(kb, (fan_out,), jnp.float32, -bound, bound)
    return w, b


def pack_params(raw_params):
    """Pad weights to lane multiples, fuse biases via the ones-lane trick,
    and cast to bf16.  Done once, outside the kernel."""
    (w1, b1), (w2, b2), (w3, b3), (w4, b4) = raw_params

    def pad_fused(w, b, in_pad, out_pad, ones_in, ones_out):
        fi, fo = w.shape
        W = jnp.zeros((in_pad, out_pad), jnp.float32)
        W = W.at[:fi, :fo].set(w)             # real weights
        W = W.at[ones_in, :fo].set(b)         # bias row (multiplied by the 1-lane)
        W = W.at[ones_in, ones_out].set(1.0)  # propagate the ones lane forward
        return W.astype(jnp.bfloat16)

    W1 = pad_fused(w1, b1, D_IN, D_H1, ONE_IN, ONE_H1)
    W2 = pad_fused(w2, b2, D_H1, D_H2, ONE_H1, ONE_H2)
    W3 = pad_fused(w3, b3, D_H2, D_H3, ONE_H2, ONE_H3)

    # Final layer as a (1, 128) row: lanes 0..99 = w4[:,0], lane 127 = b4.
    W4 = jnp.zeros((1, D_H3), jnp.float32)
    W4 = W4.at[0, : w4.shape[0]].set(w4[:, 0])
    W4 = W4.at[0, ONE_H3].set(b4[0])
    W4 = W4.astype(jnp.bfloat16)

    return W1, W2, W3, W4


def mynetwork_forward(x, packed):
    W1, W2, W3, W4 = packed
    B = x.shape[0]

    # Batch tiling: big tiles amortize the ~600-cycle per-step overhead; small
    # batches run in a single grid step (block == full array, so the (8,128)
    # rules are satisfied by "block equals full dim").
    if B >= 1024:
        tile_b = 1024
    elif B >= 512:
        tile_b = 512
    else:
        tile_b = ((B + 7) // 8) * 8
    b_pad = ((B + tile_b - 1) // tile_b) * tile_b

    # Pad batch + features, set the "ones" lane (bias carrier), pre-cast to
    # bf16 so the per-tile HBM read of x is half-width.
    xp = jnp.zeros((b_pad, D_IN), jnp.float32)
    xp = xp.at[:B, : x.shape[1]].set(x)
    xp = xp.at[:, ONE_IN].set(1.0)
    xp = xp.astype(jnp.bfloat16)

    out = pl.pallas_call(
        mlp_kernel,
        out_shape=jax.ShapeDtypeStruct((b_pad, 1), jnp.float32),
        grid=(b_pad // tile_b,),
        in_specs=[
            pl.BlockSpec((tile_b, D_IN), lambda i: (i, 0)),   # x: tiled over batch
            pl.BlockSpec((D_IN, D_H1), lambda i: (0, 0)),     # W1: VMEM-resident
            pl.BlockSpec((D_H1, D_H2), lambda i: (0, 0)),     # W2: VMEM-resident
            pl.BlockSpec((D_H2, D_H3), lambda i: (0, 0)),     # W3: VMEM-resident
            pl.BlockSpec((1, D_H3), lambda i: (0, 0)),        # w4 row: VMEM-resident
        ],
        out_specs=pl.BlockSpec((tile_b, 1), lambda i: (i, 0)),
        compiler_params=pltpu.CompilerParams(
            dimension_semantics=("parallel",),
        ),
    )(xp, W1, W2, W3, W4)

    return out[:B]


def reference_forward(x, raw_params):
    # Pure f32 reference matching the PyTorch module exactly.
    (w1, b1), (w2, b2), (w3, b3), (w4, b4) = raw_params
    h = jnp.maximum(x @ w1 + b1, 0.0)
    h = jnp.maximum(h @ w2 + b2, 0.0)
    h = jnp.maximum(h @ w3 + b3, 0.0)
    return jax.nn.sigmoid(h @ w4 + b4)


if __name__ == "__main__":
    key = jax.random.PRNGKey(0)
    k_x, k1, k2, k3, k4 = jax.random.split(key, 5)

    B = 8
    x = jax.random.normal(k_x, (B, 10), jnp.float32)

    raw_params = (
        init_linear(k1, 10, 100),
        init_linear(k2, 100, 500),
        init_linear(k3, 500, 100),
        init_linear(k4, 100, 1),
    )
    packed = pack_params(raw_params)

    fwd = jax.jit(mynetwork_forward)
    out = jax.block_until_ready(fwd(x, packed))

    ref = reference_forward(x, raw_params)
    assert out.shape == (B, 1)
    # bf16 weights/activations on the MXU -> relaxed tolerance vs. f32 ref.
    assert jnp.allclose(out, ref, atol=2e-2), (out, ref)

    print("KERNEL_OK")
</pallas_src>

<mosaic_0001>
module attributes {stable_mosaic.version = 11 : i64} {
  func.func @mlp_kernel(%arg0: i32, %arg1: memref<8x16xbf16, #tpu.memory_space<vmem>>, %arg2: memref<16x128xbf16, #tpu.memory_space<vmem>>, %arg3: memref<128x512xbf16, #tpu.memory_space<vmem>>, %arg4: memref<512x128xbf16, #tpu.memory_space<vmem>>, %arg5: memref<1x128xbf16, #tpu.memory_space<vmem>>, %arg6: memref<8x1xf32, #tpu.memory_space<vmem>>) attributes {dimension_semantics = [#tpu.dimension_semantics<parallel>], iteration_bounds = array<i64: 1>, scalar_prefetch = 0 : i64, scratch_operands = 0 : i64, tpu.core_type = #tpu.core_type<tc>, window_params = [{transform_indices = @transform_0, window_bounds = array<i64: 8, 16>}, {pipeline_mode = #tpu.pipeline_mode<synchronous>, transform_indices = @transform_1, window_bounds = array<i64: 16, 128>}, {pipeline_mode = #tpu.pipeline_mode<synchronous>, transform_indices = @transform_2, window_bounds = array<i64: 128, 512>}, {pipeline_mode = #tpu.pipeline_mode<synchronous>, transform_indices = @transform_3, window_bounds = array<i64: 512, 128>}, {pipeline_mode = #tpu.pipeline_mode<synchronous>, transform_indices = @transform_4, window_bounds = array<i64: 1, 128>}, {transform_indices = @transform_5, window_bounds = array<i64: 8, 1>}]} {
    %c0 = arith.constant 0 : index
    %c0_0 = arith.constant 0 : index
    %0 = vector.load %arg1[%c0, %c0_0] : memref<8x16xbf16, #tpu.memory_space<vmem>>, vector<8x16xbf16>
    %c0_1 = arith.constant 0 : index
    %c0_2 = arith.constant 0 : index
    %1 = vector.load %arg2[%c0_1, %c0_2] : memref<16x128xbf16, #tpu.memory_space<vmem>>, vector<16x128xbf16>
    %cst = arith.constant dense<0.000000e+00> : vector<8x128xf32>
    %2 = tpu.matmul %0, %1, %cst {dimension_numbers = #tpu.dot_dimension_numbers<[1], [0], [0], [1], [0, 0, 1, 1], [], []>} : vector<8x16xbf16>, vector<16x128xbf16>, vector<8x128xf32> -> vector<8x128xf32>
    %cst_3 = arith.constant 0.000000e+00 : f32
    %3 = vector.broadcast %cst_3 : f32 to vector<8x128xf32>
    %4 = arith.maximumf %2, %3 : vector<8x128xf32>
    %5 = arith.truncf %4 : vector<8x128xf32> to vector<8x128xbf16>
    %c0_4 = arith.constant 0 : index
    %c0_5 = arith.constant 0 : index
    %6 = vector.load %arg3[%c0_4, %c0_5] : memref<128x512xbf16, #tpu.memory_space<vmem>>, vector<128x512xbf16>
    %cst_6 = arith.constant dense<0.000000e+00> : vector<8x512xf32>
    %7 = tpu.matmul %5, %6, %cst_6 {dimension_numbers = #tpu.dot_dimension_numbers<[1], [0], [0], [1], [0, 0, 1, 1], [], []>} : vector<8x128xbf16>, vector<128x512xbf16>, vector<8x512xf32> -> vector<8x512xf32>
    %cst_7 = arith.constant 0.000000e+00 : f32
    %8 = vector.broadcast %cst_7 : f32 to vector<8x512xf32>
    %9 = arith.maximumf %7, %8 : vector<8x512xf32>
    %10 = arith.truncf %9 : vector<8x512xf32> to vector<8x512xbf16>
    %c0_8 = arith.constant 0 : index
    %c0_9 = arith.constant 0 : index
    %11 = vector.load %arg4[%c0_8, %c0_9] : memref<512x128xbf16, #tpu.memory_space<vmem>>, vector<512x128xbf16>
    %cst_10 = arith.constant dense<0.000000e+00> : vector<8x128xf32>
    %12 = tpu.matmul %10, %11, %cst_10 {dimension_numbers = #tpu.dot_dimension_numbers<[1], [0], [0], [1], [0, 0, 1, 1], [], []>} : vector<8x512xbf16>, vector<512x128xbf16>, vector<8x128xf32> -> vector<8x128xf32>
    %cst_11 = arith.constant 0.000000e+00 : f32
    %13 = vector.broadcast %cst_11 : f32 to vector<8x128xf32>
    %14 = arith.maximumf %12, %13 : vector<8x128xf32>
    %c0_12 = arith.constant 0 : index
    %c0_13 = arith.constant 0 : index
    %15 = vector.load %arg5[%c0_12, %c0_13] : memref<1x128xbf16, #tpu.memory_space<vmem>>, vector<1x128xbf16>
    %16 = arith.extf %15 : vector<1x128xbf16> to vector<1x128xf32>
    %17 = vector.broadcast %16 : vector<1x128xf32> to vector<8x128xf32>
    %18 = arith.mulf %14, %17 : vector<8x128xf32>
    %cst_14 = arith.constant dense<0.000000e+00> : vector<8xf32>
    %19 = vector.multi_reduction <add>, %18, %cst_14 [1] : vector<8x128xf32> to vector<8xf32>
    %20 = vector.shape_cast %19 : vector<8xf32> to vector<8x1xf32>
    %21 = arith.negf %20 : vector<8x1xf32>
    %22 = math.exp %21 : vector<8x1xf32>
    %cst_15 = arith.constant 1.000000e+00 : f32
    %23 = vector.broadcast %cst_15 : f32 to vector<8x1xf32>
    %24 = arith.addf %23, %22 : vector<8x1xf32>
    %25 = arith.divf %23, %24 : vector<8x1xf32>
    %c0_16 = arith.constant 0 : index
    %c0_17 = arith.constant 0 : index
    %26 = vector.load %arg6[%c0_16, %c0_17] : memref<8x1xf32, #tpu.memory_space<vmem>>, vector<8x1xf32>
    tpu.vector_store %arg6[%c0_16, %c0_17], %25 {strides = array<i32>} : memref<8x1xf32, #tpu.memory_space<vmem>>, vector<8x1xf32>,
    return
  }
  func.func @transform_0(%arg0: i32) -> (i32, i32) {
    %c0_i32 = arith.constant 0 : i32
    %c0_i32_0 = arith.constant 0 : i32
    return %arg0, %c0_i32 : i32, i32
  }
  func.func @transform_1(%arg0: i32) -> (i32, i32) {
    %c0_i32 = arith.constant 0 : i32
    %c0_i32_0 = arith.constant 0 : i32
    %c0_i32_1 = arith.constant 0 : i32
    return %c0_i32, %c0_i32_0 : i32, i32
  }
  func.func @transform_2(%arg0: i32) -> (i32, i32) {
    %c0_i32 = arith.constant 0 : i32
    %c0_i32_0 = arith.constant 0 : i32
    %c0_i32_1 = arith.constant 0 : i32
    return %c0_i32, %c0_i32_0 : i32, i32
  }
  func.func @transform_3(%arg0: i32) -> (i32, i32) {
    %c0_i32 = arith.constant 0 : i32
    %c0_i32_0 = arith.constant 0 : i32
    %c0_i32_1 = arith.constant 0 : i32
    return %c0_i32, %c0_i32_0 : i32, i32
  }
  func.func @transform_4(%arg0: i32) -> (i32, i32) {
    %c0_i32 = arith.constant 0 : i32
    %c0_i32_0 = arith.constant 0 : i32
    %c0_i32_1 = arith.constant 0 : i32
    return %c0_i32, %c0_i32_0 : i32, i32
  }
  func.func @transform_5(%arg0: i32) -> (i32, i32) {
    %c0_i32 = arith.constant 0 : i32
    %c0_i32_0 = arith.constant 0 : i32
    return %arg0, %c0_i32 : i32, i32
  }
}

</mosaic_0001>

<bundles_post_ra>
// kernel: mynetwork_forward.1
= control target key start
LH: loop header
LB: loop body
LE: loop exit
PB: predicated region body
PF: predicated region fallthrough
CT: control target
= control target key end

     0   :  { %10 = vsyncpa [#allocation3], 0  ;;  %s1082_s0 = inlined_call_operand.vmem [shape: bf16[8,16], index: 0, kind: input, shape index: {}]   ;;  %s1083_s1 = inlined_call_operand.vmem [shape: bf16[16,128], index: 1, kind: input, shape index: {}]   ;;  %s1084_s2 = inlined_call_operand.hbm [shape: bf16[128,512], index: 2, kind: input, shape index: {}]   ;;  %s1085_s3 = inlined_call_operand.hbm [shape: bf16[512,128], index: 3, kind: input, shape index: {}]   ;;  %s1086_s4 = inlined_call_operand.vmem [shape: bf16[1,128], index: 4, kind: input, shape index: {}]   ;;  %s1087_s5 = inlined_call_operand.vmem [shape: f32[8,1], index: 5, kind: output, shape index: {}]  }
   0x1   :  { %11 = vsyncpa [#allocation5], 0  ;;  %s1007_s18 = smov [#allocation2]   ;;  %s959_s22 = scalar_lea.hbm %s1084_s2, 4096 }
   0x2   :  { %s21_s19 = sshll.u32 %s1007_s18, 4  ;;  %p960_p0 = scmp.ne.s32.totalorder %s1084_s2, %s959_s22  ;;  %s22_s19 = int_to_ptr.vmem [resolvable:$true] %s21_s19 }
   0x3   :  { %p963_p1 = scmp.lt.u32.totalorder %s959_s22, %s1084_s2 }
   0x5   :  { %p965_p2 = pnand %p963_p1, %p960_p0 }
   0x7   :  { %968 = shalt.err (!%p965_p2)
}
   0x8   :  { %s969_s27 = scalar_lea.vmem %s22_s19, 4096  ;;  %p974_p4 = scmp.lt.s32.totalorder %s22_s19, %s22_s19 }
   0x9   :  { %p970_p3 = scmp.ne.s32.totalorder %s22_s19, %s969_s27  ;;  %p975_p5 = scmp.lt.s32.totalorder %s969_s27, %s969_s27 }
   0xb   :  { %p976_p6 = por %p975_p5, %p974_p4 }
   0xd   :  { %p977_p7 = pnand %p976_p6, %p970_p3 }
   0xf   :  { %980 = shalt.err (!%p977_p7)
}
  0x10   :  { %s1008_s28 = smov 256   ;;  %s1009_s29 = smov 16  }
  0x11   :  { %27 = dma.hbm_to_vmem [thread:$0]  %s1084_s2, 4096, %s22_s19, [#allocation3], %s1008_s28, %s1008_s28, %s1009_s29  }
  0x12   :  { %s1010_s7 = smov [#allocation4]   ;;  %s981_s11 = scalar_lea.hbm %s1085_s3, 4096 }
  0x13   :  { %s33_s8 = sshll.u32 %s1010_s7, 4  ;;  %p982_p8 = scmp.ne.s32.totalorder %s1085_s3, %s981_s11  ;;  %s34_s8 = int_to_ptr.vmem [resolvable:$true] %s33_s8 }
  0x14   :  { %p985_p9 = scmp.lt.u32.totalorder %s981_s11, %s1085_s3 }
  0x16   :  { %p987_p10 = pnand %p985_p9, %p982_p8 }
  0x18   :  { %990 = shalt.err (!%p987_p10)
}
  0x19   :  { %s991_s16 = scalar_lea.vmem %s34_s8, 4096  ;;  %p996_p12 = scmp.lt.s32.totalorder %s34_s8, %s34_s8 }
  0x1a   :  { %p992_p11 = scmp.ne.s32.totalorder %s34_s8, %s991_s16  ;;  %p997_p13 = scmp.lt.s32.totalorder %s991_s16, %s991_s16 }
  0x1c   :  { %p998_p0 = por %p997_p13, %p996_p12 }
  0x1e   :  { %p999_p1 = pnand %p998_p0, %p992_p11 }
  0x20   :  { %1002 = shalt.err (!%p999_p1)
}
  0x21   :  { %s1011_s2 = smov 64   ;;  %s1012_s17 = smov 4  }
  0x22   :  { %39 = dma.hbm_to_vmem [thread:$0]  %s1085_s3, 4096, %s34_s8, [#allocation5], %s1011_s2, %s1011_s2, %s1012_s17  }
  0x23   :  { %1003 = dma.done.wait [#allocation3], 4096  }
  0x24   :  { %1004 = vsyncadd [#allocation3], 4294963200 }
  0x25   :  { %1005 = dma.done.wait [#allocation5], 4096  }
  0x26   :  { %1006 = vsyncadd [#allocation5], 4294963200  ;;  %v1013_v0 = vmov 0.0   ;;  %vm1014_vm0 = vmmov 0   ;;  %v874_v1 = vld [vmem:[%s1083_s1] sm:$0xff]   ;;  %vm58_vm1 = vcmask 130048  }
  0x27   :  { %859 = vmatprep.subr.bf16.mxu0 %v1013_v0  ;;  %861 = vmatprep.mubr.msk.bf16.mxu0 %vm1014_vm0, %v1013_v0  ;;  %v49_v2 = vld [vmem:[%s1082_s0] sm:$0xf]  ;;  %v875_v3 = vld [vmem:[#allocation2 + $0x4] ss:$16 sps:$4 sm:$0xff]   ;;  %v877_v4 = vld [vmem:[#allocation2 + $0x8] ss:$16 sps:$4 sm:$0xff]  }
  0x28   :  { %860 = vmatpush3.bf16.msra.mxu0 %v874_v1  ;;  %v879_v5 = vld [vmem:[#allocation2 + $0xc] ss:$16 sps:$4 sm:$0xff]   ;;  %v880_v6 = vld [vmem:[#allocation2] ss:$16 sps:$4 sm:$0xff]   ;;  %296 = vmatprep.subr.bf16.mxu1 %v875_v3  ;;  %v881_v7 = vld [vmem:[#allocation2 + $0x24] ss:$16 sps:$4 sm:$0xff]  }
  0x29   :  { %337 = vmatprep.subr.bf16.mxu0 %v879_v5  ;;  %v883_v8 = vld [vmem:[#allocation2 + $0x28] ss:$16 sps:$4 sm:$0xff]   ;;  %297 = vmatpush1.bf16.msra.mxu1 %v880_v6  ;;  %v885_v9 = vld [vmem:[#allocation2 + $0x2c] ss:$16 sps:$4 sm:$0xff]   ;;  %v886_v10 = vld [vmem:[#allocation2 + $0x20] ss:$16 sps:$4 sm:$0xff]  }
  0x2a   :  { %298 = vmatprep.subr.bf16.mxu1 %v881_v7  ;;  %v887_v11 = vld [vmem:[#allocation2 + $0x44] ss:$16 sps:$4 sm:$0xff]   ;;  %v891_v12 = vld [vmem:[#allocation2 + $0x4c] ss:$16 sps:$4 sm:$0xff]   ;;  %v889_v13 = vld [vmem:[#allocation2 + $0x48] ss:$16 sps:$4 sm:$0xff]  }
  0x2b   :  { %862 = vmatmul.mubr.msk.bf16.vlgmr.msra.gmra.mrb[0].mxu0 %vm58_vm1, %v49_v2  ;;  %v892_v14 = vld [vmem:[#allocation2 + $0x40] ss:$16 sps:$4 sm:$0xff]   ;;  %v893_v15 = vld [vmem:[#allocation2 + $0x64] ss:$16 sps:$4 sm:$0xff]   ;;  %v897_v16 = vld [vmem:[#allocation2 + $0x6c] ss:$16 sps:$4 sm:$0xff]  }
  0x2c   :  { %338 = vmatpush1.bf16.msra.mxu0 %v877_v4  ;;  %v895_v17 = vld [vmem:[#allocation2 + $0x68] ss:$16 sps:$4 sm:$0xff]   ;;  %v898_v18 = vld [vmem:[#allocation2 + $0x60] ss:$16 sps:$4 sm:$0xff]   ;;  %v899_v19 = vld [vmem:[#allocation2 + $0x84] ss:$16 sps:$4 sm:$0xff]  }
  0x2d   :  { %339 = vmatprep.subr.bf16.mxu0 %v885_v9  ;;  %299 = vmatpush1.bf16.msra.mxu1 %v886_v10  ;;  %v903_v20 = vld [vmem:[#allocation2 + $0x8c] ss:$16 sps:$4 sm:$0xff]   ;;  %v901_v21 = vld [vmem:[#allocation2 + $0x88] ss:$16 sps:$4 sm:$0xff]   ;;  %v904_v22 = vld [vmem:[#allocation2 + $0x80] ss:$16 sps:$4 sm:$0xff]  }
  0x2e   :  { %300 = vmatprep.subr.bf16.mxu1 %v887_v11  ;;  %v905_v23 = vld [vmem:[#allocation2 + $0xa4] ss:$16 sps:$4 sm:$0xff]   ;;  %v909_v24 = vld [vmem:[#allocation2 + $0xac] ss:$16 sps:$4 sm:$0xff]   ;;  %v907_v25 = vld [vmem:[#allocation2 + $0xa8] ss:$16 sps:$4 sm:$0xff]  }
  0x2f   :  { %v910_v26 = vld [vmem:[#allocation2 + $0xa0] ss:$16 sps:$4 sm:$0xff]   ;;  %v911_v27 = vld [vmem:[#allocation2 + $0xc4] ss:$16 sps:$4 sm:$0xff]   ;;  %v915_v28 = vld [vmem:[#allocation2 + $0xcc] ss:$16 sps:$4 sm:$0xff]  }
  0x30   :  { %340 = vmatpush1.bf16.msra.mxu0 %v883_v8  ;;  %v913_v29 = vld [vmem:[#allocation2 + $0xc8] ss:$16 sps:$4 sm:$0xff]   ;;  %v916_v30 = vld [vmem:[#allocation2 + $0xc0] ss:$16 sps:$4 sm:$0xff]   ;;  %v917_v31 = vld [vmem:[#allocation2 + $0xe4] ss:$16 sps:$4 sm:$0xff]  }
  0x31   :  { %341 = vmatprep.subr.bf16.mxu0 %v891_v12  ;;  %301 = vmatpush1.bf16.msra.mxu1 %v892_v14  ;;  %v921_v32 = vld [vmem:[#allocation2 + $0xec] ss:$16 sps:$4 sm:$0xff]   ;;  %v919_v33 = vld [vmem:[#allocation2 + $0xe8] ss:$16 sps:$4 sm:$0xff]   ;;  %v922_v34 = vld [vmem:[#allocation2 + $0xe0] ss:$16 sps:$4 sm:$0xff]  }
  0x32   :  { %302 = vmatprep.subr.bf16.mxu1 %v893_v15  ;;  %v1015_v35 = vmov 0   ;;  %v923_v36 = vld [vmem:[#allocation4 + $0x40] sm:$0xff]   ;;  %v927_v46 = vld [vmem:[#allocation4 + $0x48] sm:$0xff]   ;;  %v931_v50 = vld [vmem:[#allocation4 + $0x50] sm:$0xff]   ;;  %vm738_vm2 = vcmask 7168  }
  0x33   :  { %328 = vmatprep.mubr.bf16.mxu1 %v1015_v35  ;;  %369 = vmatprep.mubr.bf16.mxu0 %v1015_v35  ;;  %v924_v37 = vld [vmem:[#allocation4 + $0xc0] sm:$0xff]   ;;  %v928_v47 = vld [vmem:[#allocation4 + $0xc8] sm:$0xff]   ;;  %v932_v51 = vld [vmem:[#allocation4 + $0xd0] sm:$0xff]  }
  0x34   :  { %342 = vmatpush1.bf16.msra.mxu0 %v889_v13  ;;  %v925_v42 = vld [vmem:[#allocation4] sm:$0xff]   ;;  %v929_v48 = vld [vmem:[#allocation4 + $0x8] sm:$0xff]   ;;  %v933_v52 = vld [vmem:[#allocation4 + $0x10] sm:$0xff]  }
  0x35   :  { %343 = vmatprep.subr.bf16.mxu0 %v897_v16  ;;  %303 = vmatpush1.bf16.msra.mxu1 %v898_v18  ;;  %v926_v43 = vld [vmem:[#allocation4 + $0x80] sm:$0xff]   ;;  %v930_v49 = vld [vmem:[#allocation4 + $0x88] sm:$0xff]   ;;  %v934_v53 = vld [vmem:[#allocation4 + $0x90] sm:$0xff]  }
  0x36   :  { %304 = vmatprep.subr.bf16.mxu1 %v899_v19  ;;  %v935_v54 = vld [vmem:[#allocation4 + $0x58] sm:$0xff]   ;;  %v939_v58 = vld [vmem:[#allocation4 + $0x60] sm:$0xff]   ;;  %v943_v62 = vld [vmem:[#allocation4 + $0x68] sm:$0xff]  }
  0x37   :  { %v936_v55 = vld [vmem:[#allocation4 + $0xd8] sm:$0xff]   ;;  %v940_v59 = vld [vmem:[#allocation4 + $0xe0] sm:$0xff]   ;;  %v944_v63 = vld [vmem:[#allocation4 + $0xe8] sm:$0xff]  }
  0x38   :  { %344 = vmatpush1.bf16.msra.mxu0 %v895_v17  ;;  %v937_v56 = vld [vmem:[#allocation4 + $0x18] sm:$0xff]   ;;  %v941_v60 = vld [vmem:[#allocation4 + $0x20] sm:$0xff]   ;;  %v945_v0 = vld [vmem:[#allocation4 + $0x28] sm:$0xff]  }
  0x39   :  { %345 = vmatprep.subr.bf16.mxu0 %v903_v20  ;;  %305 = vmatpush1.bf16.msra.mxu1 %v904_v22  ;;  %v938_v57 = vld [vmem:[#allocation4 + $0x98] sm:$0xff]   ;;  %v942_v61 = vld [vmem:[#allocation4 + $0xa0] sm:$0xff]   ;;  %v946_v1 = vld [vmem:[#allocation4 + $0xa8] sm:$0xff]  }
  0x3a   :  { %306 = vmatprep.subr.bf16.mxu1 %v905_v23  ;;  %v947_v2 = vld [vmem:[#allocation4 + $0x70] sm:$0xff]   ;;  %v951_v6 = vld [vmem:[#allocation4 + $0x78] sm:$0xff]  }
  0x3b   :  { %v948_v3 = vld [vmem:[#allocation4 + $0xf0] sm:$0xff]   ;;  %v952_v7 = vld [vmem:[#allocation4 + $0xf8] sm:$0xff]  }
  0x3c   :  { %346 = vmatpush1.bf16.msra.mxu0 %v901_v21  ;;  %v949_v4 = vld [vmem:[#allocation4 + $0x30] sm:$0xff]   ;;  %v953_v8 = vld [vmem:[#allocation4 + $0x38] sm:$0xff]  }
  0x3d   :  { %347 = vmatprep.subr.bf16.mxu0 %v909_v24  ;;  %307 = vmatpush1.bf16.msra.mxu1 %v910_v26  ;;  %v950_v5 = vld [vmem:[#allocation4 + $0xb0] sm:$0xff]   ;;  %v954_v9 = vld [vmem:[#allocation4 + $0xb8] sm:$0xff]   ;;  %v725_v26 = vlaneseq }
  0x3e   :  { %308 = vmatprep.subr.bf16.mxu1 %v911_v27 }
  0x3f   :  { %v726_v27 = vshrl.u32 %v725_v26, 7 }
  0x40   :  { %348 = vmatpush1.bf16.msra.mxu0 %v907_v25 }
  0x41   :  { %349 = vmatprep.subr.bf16.mxu0 %v915_v28  ;;  %309 = vmatpush1.bf16.msra.mxu1 %v916_v30  ;;  %v723_v28 = vld [vmem:[%s1086_s4] sm:$0x1] }
  0x42   :  { %310 = vmatprep.subr.bf16.mxu1 %v917_v31  ;;  %v724_v31 = vunpack.c.l.bf16 %v723_v28 }
  0x44   :  { %350 = vmatpush1.bf16.msra.mxu0 %v913_v29 }
  0x45   :  { %351 = vmatprep.subr.bf16.mxu0 %v921_v32  ;;  %311 = vmatpush1.bf16.msra.mxu1 %v922_v34  ;;  %v727_v32 = vsub.s32 0, %v726_v27 }
  0x46   :  { %815 = vmatprep.subr.bf16.mxu1 %v923_v36 }
  0x48   :  { %352 = vmatpush1.bf16.msra.mxu0 %v919_v33 }
  0x49   :  { %837 = vmatprep.subr.bf16.mxu0 %v924_v37 }
  0xfe   :  { %v96_v38 = vpop.f32.mrb[0].mxu0 }
  0xff   :  { %v102_v39 = vmax.f32 %v96_v38, 0.0  ;;  %v863_v40 = vpop.f32.mrb[1].mxu0 }
 0x100   :  { %v99_v41 = vpop.f32.mrb[2].mxu0 }
 0x101   :  { %v103_v44 = vpack.c.bf16 %v102_v39, %v102_v39  ;;  %v864_v45 = vpop.f32.mrb[3].mxu0 }
 0x103   :  { %329 = vmatmul.mubr.bf16.vlgmr.msra.gmra.mrb[0].mxu1 %v103_v44  ;;  %370 = vmatmul.mubr.bf16.vlgmr.msra.gmra.mrb[4].mxu0 %v103_v44 }
 0x104   :  { %816 = vmatpush3.bf16.msra.mxu1 %v925_v42  ;;  %838 = vmatpush3.bf16.msra.mxu0 %v926_v43  ;;  %v728_v42 = vrot.slane %v724_v31, %v727_v32 }
 0x105   :  { %817 = vmatprep.subr.bf16.mxu1 %v927_v46  ;;  %839 = vmatprep.subr.bf16.mxu0 %v928_v47 }
 0x108   :  { %818 = vmatpush3.bf16.msra.mxu1 %v929_v48  ;;  %840 = vmatpush3.bf16.msra.mxu0 %v930_v49 }
 0x109   :  { %819 = vmatprep.subr.bf16.mxu1 %v931_v50  ;;  %841 = vmatprep.subr.bf16.mxu0 %v932_v51 }
 0x10c   :  { %820 = vmatpush3.bf16.msra.mxu1 %v933_v52  ;;  %842 = vmatpush3.bf16.msra.mxu0 %v934_v53 }
 0x10d   :  { %821 = vmatprep.subr.bf16.mxu1 %v935_v54  ;;  %843 = vmatprep.subr.bf16.mxu0 %v936_v55 }
 0x110   :  { %822 = vmatpush3.bf16.msra.mxu1 %v937_v56  ;;  %844 = vmatpush3.bf16.msra.mxu0 %v938_v57 }
 0x111   :  { %823 = vmatprep.subr.bf16.mxu1 %v939_v58  ;;  %845 = vmatprep.subr.bf16.mxu0 %v940_v59 }
 0x114   :  { %824 = vmatpush3.bf16.msra.mxu1 %v941_v60  ;;  %846 = vmatpush3.bf16.msra.mxu0 %v942_v61 }
 0x115   :  { %825 = vmatprep.subr.bf16.mxu1 %v943_v62  ;;  %847 = vmatprep.subr.bf16.mxu0 %v944_v63 }
 0x118   :  { %826 = vmatpush3.bf16.msra.mxu1 %v945_v0  ;;  %848 = vmatpush3.bf16.msra.mxu0 %v946_v1 }
 0x119   :  { %827 = vmatprep.subr.bf16.mxu1 %v947_v2  ;;  %849 = vmatprep.subr.bf16.mxu0 %v948_v3 }
 0x11c   :  { %828 = vmatpush3.bf16.msra.mxu1 %v949_v4  ;;  %850 = vmatpush3.bf16.msra.mxu0 %v950_v5 }
 0x11d   :  { %829 = vmatprep.subr.bf16.mxu1 %v951_v6  ;;  %851 = vmatprep.subr.bf16.mxu0 %v952_v7 }
 0x120   :  { %830 = vmatpush3.bf16.msra.mxu1 %v953_v8  ;;  %852 = vmatpush3.bf16.msra.mxu0 %v954_v9 }
 0x1d6   :  { %v330_v10 = vpop.f32.mrb[0].mxu1  ;;  %v371_v11 = vpop.f32.mrb[4].mxu0 }
 0x1d7   :  { %v378_v12 = vmax.f32 %v330_v10, 0.0  ;;  %v380_v13 = vmax.f32 %v371_v11, 0.0  ;;  %v332_v14 = vpop.f32.mrb[1].mxu1  ;;  %v373_v15 = vpop.f32.mrb[5].mxu0 }
 0x1d8   :  { %v379_v16 = vmax.f32 %v332_v14, 0.0  ;;  %v381_v17 = vmax.f32 %v373_v15, 0.0  ;;  %v334_v18 = vpop.f32.mrb[2].mxu1  ;;  %v375_v19 = vpop.f32.mrb[6].mxu0 }
 0x1d9   :  { %v335_v20 = vpop.f32.mrb[3].mxu1  ;;  %v376_v21 = vpop.f32.mrb[7].mxu0  ;;  %v382_v24 = vpack.c.bf16 %v378_v12, %v378_v12  ;;  %v384_v25 = vpack.c.bf16 %v380_v13, %v380_v13 }
 0x1da   :  { %v383_v22 = vpack.c.bf16 %v379_v16, %v379_v16  ;;  %v385_v23 = vpack.c.bf16 %v381_v17, %v381_v17 }
 0x1dc   :  { %674 = vmatprep.mubr.bf16.mxu1 %v383_v22  ;;  %714 = vmatprep.mubr.bf16.mxu0 %v385_v23 }
 0x1dd   :  { %675 = vmatmul.mubr.bf16.vlgmr.msra.gmra.mrb[4].mxu1 %v382_v24  ;;  %715 = vmatmul.mubr.bf16.vlgmr.msra.gmra.mrb[8].mxu0 %v384_v25 }
 0x2b0   :  { %v831_v29 = vpop.f32.mrb[4].mxu1  ;;  %v853_v30 = vpop.f32.mrb[8].mxu0 }
 0x2b1   :  { %v832_v33 = vpop.f32.mrb[5].mxu1  ;;  %v854_v34 = vpop.f32.mrb[9].mxu0 }
 0x2b2   :  { %v833_v35 = vadd.f32 %v832_v33, %v831_v29  ;;  %v855_v36 = vadd.f32 %v854_v34, %v853_v30  ;;  %v834_v37 = vpop.f32.mrb[6].mxu1  ;;  %v856_v38 = vpop.f32.mrb[10].mxu0 }
 0x2b3   :  { %v835_v39 = vpop.f32.mrb[7].mxu1  ;;  %v857_v40 = vpop.f32.mrb[11].mxu0 }
 0x2b4   :  { %v717_v41 = vadd.f32 %v855_v36, %v833_v35 }
 0x2b6   :  { %v722_v43 = vmax.f32 %v717_v41, 0.0 }
 0x2b8   :  { %v729_v44 = vmul.f32 %v728_v42, %v722_v43 }
 0x2ba   :  { %730 = vadd.xlane.f32.xlu0 %v729_v44 }
 0x347   :  { %v731_v45 = vpop.xlane.xlu0 %730 }
 0x348   :  { %v812_v46 = vmul.f32 -1.442695, %v731_v45 }
 0x34a   :  { %955 = vpow2.f32 %v812_v46 }
 0x354   :  { %v956_v47 = vpop.eup %955 }
 0x355   :  { %v735_v48 = vadd.f32 1.0, %v956_v47 }
 0x357   :  { %957 = vrcp.f32 %v735_v48 }
 0x361   :  { %v958_v49 = vpop.eup %957 }
 0x362   :  { %739 = vst.msk [vmem:[%s1087_s5] sm:$0xff] %vm738_vm2, %v958_v49 }
 0x363   :  { %744 = vsyncpa [#allocation3], 1 }
 0x364   :  { %745 = vsyncpa [#allocation5], 1 }

</bundles_post_ra>
